<compile_context>
chip_gen: v7x
topology: tpu7x:2x2x1
jax: 0.10.0
libtpu: 0.0.40
codegen_flags: <defaults>
</compile_context>

<pallas_src>
import functools

import jax
import jax.numpy as jnp
from jax.experimental import pallas as pl
from jax.experimental.pallas import tpu as pltpu

SUBLANE = 8
TB_MAX = 1024  # max batch-tile rows


def _round_up(n, m):
    return ((n + m - 1) // m) * m


def _fused_mlp_kernel(*refs, num_layers):
    """One batch-tile of the fused MLP.

    refs = (x_ref, w1_ref, b1_ref, ..., wN_ref, bN_ref, o_ref).
    All weights/biases are VMEM-resident; intermediates never go to HBM.
    """
    x_ref = refs[0]
    o_ref = refs[-1]
    h = x_ref[...].astype(jnp.float32)
    for i in range(num_layers):
        w_ref = refs[1 + 2 * i]   # bf16 [din, dout]
        b_ref = refs[2 + 2 * i]   # f32  [1, dout]
        h = jnp.dot(h.astype(jnp.bfloat16), w_ref[...],
                    preferred_element_type=jnp.float32)
        h = h + b_ref[...]        # broadcast over the batch tile, f32
        if i < num_layers - 1:
            h = jnp.tanh(h)       # EUP slot, f32
    o_ref[...] = h.astype(o_ref.dtype)


def init_params(key, layer_dims):
    """Deterministic params matching PyTorch nn.Linear default init ranges.

    Weights stored pre-transposed as [in, out]; bias as [1, out].  All f32.
    """
    params = []
    for din, dout in zip(layer_dims[:-1], layer_dims[1:]):
        key, kw, kb = jax.random.split(key, 3)
        bound = 1.0 / (din ** 0.5)
        w = jax.random.uniform(kw, (din, dout), jnp.float32, -bound, bound)
        b = jax.random.uniform(kb, (1, dout), jnp.float32, -bound, bound)
        params.append((w, b))
    return params


def prepare_params(params):
    """One-time prep: weights cast to bf16 (MXU operand dtype / halved HBM
    bytes), biases kept f32.  No lane padding — nothing here needs it."""
    return [(w.astype(jnp.bfloat16), b) for (w, b) in params]


def _choose_batch_tile(batch):
    """Multiple-of-8 tile; >=2 grid blocks when possible so v7x's two
    TensorCores both get work; capped at TB_MAX to amortize per-step cost."""
    if batch <= 2 * TB_MAX:
        half = -(-batch // 2)  # ceil(batch / 2)
        return max(SUBLANE, _round_up(half, SUBLANE))
    return TB_MAX


def my_module_list_forward(x, prepared_params):
    """Equivalent of MyModuleList.forward for the Linear/Tanh list, fully
    fused into a single pallas_call tiled over the batch."""
    B, din0 = x.shape
    num_layers = len(prepared_params)
    out_dim = prepared_params[-1][0].shape[1]

    tb = _choose_batch_tile(B)
    grid = (pl.cdiv(B, tb),)   # partial last block handled by Pallas (masked writes)

    flat_inputs = [x]
    in_specs = [pl.BlockSpec((tb, din0), lambda i: (i, 0))]
    for w, b in prepared_params:
        flat_inputs.append(w)
        flat_inputs.append(b)
        # Full-array blocks, constant index map -> resident in VMEM.
        in_specs.append(pl.BlockSpec(w.shape, lambda i: (0, 0)))
        in_specs.append(pl.BlockSpec(b.shape, lambda i: (0, 0)))

    # Advisory cost estimate (real dims, bf16 weights, 32-wide output).
    flops = 0
    transcendentals = 0
    bytes_accessed = x.size * x.dtype.itemsize
    for li, (w, b) in enumerate(prepared_params):
        flops += 2 * B * w.shape[0] * w.shape[1]
        if li < num_layers - 1:
            transcendentals += B * w.shape[1]
        bytes_accessed += w.size * w.dtype.itemsize + b.size * b.dtype.itemsize
    bytes_accessed += B * out_dim * x.dtype.itemsize

    kernel = functools.partial(_fused_mlp_kernel, num_layers=num_layers)
    out = pl.pallas_call(
        kernel,
        out_shape=jax.ShapeDtypeStruct((B, out_dim), x.dtype),
        grid=grid,
        in_specs=in_specs,
        # Last dim (out_dim) equals the full array dim -> (8,128) rule OK.
        out_specs=pl.BlockSpec((tb, out_dim), lambda i: (i, 0)),
        compiler_params=pltpu.CompilerParams(
            dimension_semantics=("parallel",)),  # batch tiles across TCs on v7x
        cost_estimate=pl.CostEstimate(
            flops=int(flops),
            transcendentals=int(transcendentals),
            bytes_accessed=int(bytes_accessed)),
    )(*flat_inputs)

    return out


if __name__ == "__main__":
    key = jax.random.PRNGKey(0)
    key, kx = jax.random.split(key)

    batch = 8
    layer_dims = [32, 64, 64, 32]  # Linear(32->64), Tanh, Linear(64->64), Tanh, Linear(64->32)

    x = jax.random.normal(kx, (batch, layer_dims[0]), jnp.float32)
    params = init_params(key, layer_dims)
    prepared_params = prepare_params(params)

    out = my_module_list_forward(x, prepared_params)
    out = jax.block_until_ready(out)

    # Cross-check against plain f32 JAX reference of the same sequential
    # forward.  Tolerance accounts for bf16 MXU operands (f32 accumulation).
    ref = x
    for i, (w, b) in enumerate(params):
        ref = ref @ w + b
        if i < len(params) - 1:
            ref = jnp.tanh(ref)
    assert out.shape == (batch, layer_dims[-1])
    assert jnp.allclose(out, ref, atol=2e-2, rtol=2e-2), (
        float(jnp.max(jnp.abs(out - ref))))

    print("KERNEL_OK")
</pallas_src>

<mosaic_0001>
module attributes {stable_mosaic.version = 11 : i64} {
  func.func @_fused_mlp_kernel(%arg0: i32, %arg1: memref<8x32xf32, #tpu.memory_space<vmem>>, %arg2: memref<32x64xbf16, #tpu.memory_space<vmem>>, %arg3: memref<1x64xf32, #tpu.memory_space<vmem>>, %arg4: memref<64x64xbf16, #tpu.memory_space<vmem>>, %arg5: memref<1x64xf32, #tpu.memory_space<vmem>>, %arg6: memref<64x32xbf16, #tpu.memory_space<vmem>>, %arg7: memref<1x32xf32, #tpu.memory_space<vmem>>, %arg8: memref<8x32xf32, #tpu.memory_space<vmem>>) attributes {dimension_semantics = [#tpu.dimension_semantics<parallel>], iteration_bounds = array<i64: 1>, scalar_prefetch = 0 : i64, scratch_operands = 0 : i64, tpu.core_type = #tpu.core_type<tc>, window_params = [{transform_indices = @transform_0, window_bounds = array<i64: 8, 32>}, {pipeline_mode = #tpu.pipeline_mode<synchronous>, transform_indices = @transform_1, window_bounds = array<i64: 32, 64>}, {pipeline_mode = #tpu.pipeline_mode<synchronous>, transform_indices = @transform_2, window_bounds = array<i64: 1, 64>}, {pipeline_mode = #tpu.pipeline_mode<synchronous>, transform_indices = @transform_3, window_bounds = array<i64: 64, 64>}, {pipeline_mode = #tpu.pipeline_mode<synchronous>, transform_indices = @transform_4, window_bounds = array<i64: 1, 64>}, {pipeline_mode = #tpu.pipeline_mode<synchronous>, transform_indices = @transform_5, window_bounds = array<i64: 64, 32>}, {pipeline_mode = #tpu.pipeline_mode<synchronous>, transform_indices = @transform_6, window_bounds = array<i64: 1, 32>}, {transform_indices = @transform_7, window_bounds = array<i64: 8, 32>}]} {
    %c0 = arith.constant 0 : index
    %c0_0 = arith.constant 0 : index
    %0 = vector.load %arg1[%c0, %c0_0] : memref<8x32xf32, #tpu.memory_space<vmem>>, vector<8x32xf32>
    %1 = arith.truncf %0 : vector<8x32xf32> to vector<8x32xbf16>
    %c0_1 = arith.constant 0 : index
    %c0_2 = arith.constant 0 : index
    %2 = vector.load %arg2[%c0_1, %c0_2] : memref<32x64xbf16, #tpu.memory_space<vmem>>, vector<32x64xbf16>
    %cst = arith.constant dense<0.000000e+00> : vector<8x64xf32>
    %3 = tpu.matmul %1, %2, %cst {dimension_numbers = #tpu.dot_dimension_numbers<[1], [0], [0], [1], [0, 0, 1, 1], [], []>} : vector<8x32xbf16>, vector<32x64xbf16>, vector<8x64xf32> -> vector<8x64xf32>
    %c0_3 = arith.constant 0 : index
    %c0_4 = arith.constant 0 : index
    %4 = vector.load %arg3[%c0_3, %c0_4] : memref<1x64xf32, #tpu.memory_space<vmem>>, vector<1x64xf32>
    %5 = vector.broadcast %4 : vector<1x64xf32> to vector<8x64xf32>
    %6 = arith.addf %3, %5 : vector<8x64xf32>
    %7 = math.tanh %6 : vector<8x64xf32>
    %8 = arith.truncf %7 : vector<8x64xf32> to vector<8x64xbf16>
    %c0_5 = arith.constant 0 : index
    %c0_6 = arith.constant 0 : index
    %9 = vector.load %arg4[%c0_5, %c0_6] : memref<64x64xbf16, #tpu.memory_space<vmem>>, vector<64x64xbf16>
    %cst_7 = arith.constant dense<0.000000e+00> : vector<8x64xf32>
    %10 = tpu.matmul %8, %9, %cst_7 {dimension_numbers = #tpu.dot_dimension_numbers<[1], [0], [0], [1], [0, 0, 1, 1], [], []>} : vector<8x64xbf16>, vector<64x64xbf16>, vector<8x64xf32> -> vector<8x64xf32>
    %c0_8 = arith.constant 0 : index
    %c0_9 = arith.constant 0 : index
    %11 = vector.load %arg5[%c0_8, %c0_9] : memref<1x64xf32, #tpu.memory_space<vmem>>, vector<1x64xf32>
    %12 = vector.broadcast %11 : vector<1x64xf32> to vector<8x64xf32>
    %13 = arith.addf %10, %12 : vector<8x64xf32>
    %14 = math.tanh %13 : vector<8x64xf32>
    %15 = arith.truncf %14 : vector<8x64xf32> to vector<8x64xbf16>
    %c0_10 = arith.constant 0 : index
    %c0_11 = arith.constant 0 : index
    %16 = vector.load %arg6[%c0_10, %c0_11] : memref<64x32xbf16, #tpu.memory_space<vmem>>, vector<64x32xbf16>
    %cst_12 = arith.constant dense<0.000000e+00> : vector<8x32xf32>
    %17 = tpu.matmul %15, %16, %cst_12 {dimension_numbers = #tpu.dot_dimension_numbers<[1], [0], [0], [1], [0, 0, 1, 1], [], []>} : vector<8x64xbf16>, vector<64x32xbf16>, vector<8x32xf32> -> vector<8x32xf32>
    %c0_13 = arith.constant 0 : index
    %c0_14 = arith.constant 0 : index
    %18 = vector.load %arg7[%c0_13, %c0_14] : memref<1x32xf32, #tpu.memory_space<vmem>>, vector<1x32xf32>
    %19 = vector.broadcast %18 : vector<1x32xf32> to vector<8x32xf32>
    %20 = arith.addf %17, %19 : vector<8x32xf32>
    %c0_15 = arith.constant 0 : index
    %c0_16 = arith.constant 0 : index
    %21 = vector.load %arg8[%c0_15, %c0_16] : memref<8x32xf32, #tpu.memory_space<vmem>>, vector<8x32xf32>
    tpu.vector_store %arg8[%c0_15, %c0_16], %20 {strides = array<i32>} : memref<8x32xf32, #tpu.memory_space<vmem>>, vector<8x32xf32>,
    return
  }
  func.func @transform_0(%arg0: i32) -> (i32, i32) {
    %c0_i32 = arith.constant 0 : i32
    %c0_i32_0 = arith.constant 0 : i32
    return %arg0, %c0_i32 : i32, i32
  }
  func.func @transform_1(%arg0: i32) -> (i32, i32) {
    %c0_i32 = arith.constant 0 : i32
    %c0_i32_0 = arith.constant 0 : i32
    %c0_i32_1 = arith.constant 0 : i32
    return %c0_i32, %c0_i32_0 : i32, i32
  }
  func.func @transform_2(%arg0: i32) -> (i32, i32) {
    %c0_i32 = arith.constant 0 : i32
    %c0_i32_0 = arith.constant 0 : i32
    %c0_i32_1 = arith.constant 0 : i32
    return %c0_i32, %c0_i32_0 : i32, i32
  }
  func.func @transform_3(%arg0: i32) -> (i32, i32) {
    %c0_i32 = arith.constant 0 : i32
    %c0_i32_0 = arith.constant 0 : i32
    %c0_i32_1 = arith.constant 0 : i32
    return %c0_i32, %c0_i32_0 : i32, i32
  }
  func.func @transform_4(%arg0: i32) -> (i32, i32) {
    %c0_i32 = arith.constant 0 : i32
    %c0_i32_0 = arith.constant 0 : i32
    %c0_i32_1 = arith.constant 0 : i32
    return %c0_i32, %c0_i32_0 : i32, i32
  }
  func.func @transform_5(%arg0: i32) -> (i32, i32) {
    %c0_i32 = arith.constant 0 : i32
    %c0_i32_0 = arith.constant 0 : i32
    %c0_i32_1 = arith.constant 0 : i32
    return %c0_i32, %c0_i32_0 : i32, i32
  }
  func.func @transform_6(%arg0: i32) -> (i32, i32) {
    %c0_i32 = arith.constant 0 : i32
    %c0_i32_0 = arith.constant 0 : i32
    %c0_i32_1 = arith.constant 0 : i32
    return %c0_i32, %c0_i32_0 : i32, i32
  }
  func.func @transform_7(%arg0: i32) -> (i32, i32) {
    %c0_i32 = arith.constant 0 : i32
    %c0_i32_0 = arith.constant 0 : i32
    return %arg0, %c0_i32 : i32, i32
  }
}

</mosaic_0001>

<bundles_post_ra>
// kernel: tpu_custom_call.1
= control target key start
LH: loop header
LB: loop body
LE: loop exit
PB: predicated region body
PF: predicated region fallthrough
CT: control target
= control target key end

     0   :  { %12 = vsyncpa [#allocation3], 0  ;;  %s532_s0 = inlined_call_operand.hbm [shape: f32[8,32], index: 0, kind: input, shape index: {}]   ;;  %s533_s1 = inlined_call_operand.vmem [shape: bf16[32,64], index: 1, kind: input, shape index: {}]   ;;  %s534_s2 = inlined_call_operand.vmem [shape: f32[1,64], index: 2, kind: input, shape index: {}]   ;;  %s535_s3 = inlined_call_operand.vmem [shape: bf16[64,64], index: 3, kind: input, shape index: {}]   ;;  %s536_s4 = inlined_call_operand.vmem [shape: f32[1,64], index: 4, kind: input, shape index: {}]   ;;  %s537_s5 = inlined_call_operand.vmem [shape: bf16[64,32], index: 5, kind: input, shape index: {}]   ;;  %s538_s6 = inlined_call_operand.vmem [shape: f32[1,32], index: 6, kind: input, shape index: {}]   ;;  %s539_s7 = inlined_call_operand.hbm [shape: f32[8,32], index: 7, kind: output, shape index: {}]  }
   0x1   :  { %13 = vsyncpa [#allocation4], 0  ;;  %s421_s24 = smov [#allocation2]   ;;  %s373_s28 = scalar_lea.hbm %s532_s0, 128 }
   0x2   :  { %s20_s25 = sshll.u32 %s421_s24, 4  ;;  %p374_p0 = scmp.ne.s32.totalorder %s532_s0, %s373_s28  ;;  %s21_s25 = int_to_ptr.vmem [resolvable:$true] %s20_s25 }
   0x3   :  { %p377_p1 = scmp.lt.u32.totalorder %s373_s28, %s532_s0 }
   0x5   :  { %p379_p2 = pnand %p377_p1, %p374_p0 }
   0x7   :  { %382 = shalt.err (!%p379_p2)
}
   0x8   :  { %s383_s10 = scalar_lea.vmem %s21_s25, 128  ;;  %p388_p4 = scmp.lt.s32.totalorder %s21_s25, %s21_s25 }
   0x9   :  { %p384_p3 = scmp.ne.s32.totalorder %s21_s25, %s383_s10  ;;  %p389_p5 = scmp.lt.s32.totalorder %s383_s10, %s383_s10 }
   0xb   :  { %p390_p6 = por %p389_p5, %p388_p4 }
   0xd   :  { %p391_p7 = pnand %p390_p6, %p384_p3 }
   0xf   :  { %394 = shalt.err (!%p391_p7)
}
  0x10   :  { %23 = dma.hbm_to_vmem [thread:$0]  %s532_s0, 128, %s21_s25, [#allocation3]  }
  0x11   :  { %417 = dma.done.wait [#allocation3], 128  }
  0x12   :  { %418 = vsyncadd [#allocation3], 4294967168  ;;  %v422_v0 = vmov 0.0   ;;  %vm423_vm0 = vmmov 0   ;;  %v359_v1 = vld [vmem:[%s533_s1] sm:$0xff]   ;;  %v360_v2 = vld [vmem:[%s533_s1 + $0x8] sm:$0xff]  }
  0x13   :  { %323 = vmatprep.subr.bf16.mxu0 %v422_v0  ;;  %327 = vmatprep.mubr.msk.bf16.mxu0 %vm423_vm0, %v422_v0  ;;  %v40_v3 = vld [vmem:[#allocation2] sm:$0xff]  ;;  %vm65_vm1 = vcmask 261120   ;;  %v362_v6 = vld [vmem:[%s535_s3 + $0x8] sm:$0xff]   ;;  %v363_v7 = vld [vmem:[%s535_s3 + $0x10] sm:$0xff]   ;;  %vm150_vm2 = vcmask 523264  }
  0x14   :  { %331 = vmatprep.subr.bf16.mxu1 %v422_v0  ;;  %339 = vmatprep.mubr.msk.bf16.mxu1 %vm423_vm0, %v422_v0  ;;  %v41_v4 = vpack.c.bf16 %v40_v3, %v40_v3  ;;  %v361_v5 = vld [vmem:[%s535_s3] sm:$0xff]   ;;  %v364_v8 = vld [vmem:[%s535_s3 + $0x18] sm:$0xff]   ;;  %v366_v18 = vld [vmem:[%s537_s5 + $0x8] sm:$0xff]  }
  0x15   :  { %324 = vmatpush3.bf16.msra.mxu0 %v359_v1  ;;  %332 = vmatpush3.bf16.msra.mxu1 %v361_v5  ;;  %v294_v9 = vld [vmem:[%s534_s2] ss:$0 sm:$0xff]  ;;  %v367_v19 = vld [vmem:[%s537_s5 + $0x10] sm:$0xff]   ;;  %v368_v20 = vld [vmem:[%s537_s5 + $0x18] sm:$0xff]  }
  0x16   :  { %325 = vmatprep.subr.bf16.mxu0 %v422_v0  ;;  %333 = vmatprep.subr.bf16.mxu1 %v422_v0  ;;  %v365_v17 = vld [vmem:[%s537_s5] sm:$0xff]   ;;  %s424_s5 = smov [#allocation5]  }
  0x17   :  { %v298_v21 = vld [vmem:[%s536_s4] ss:$0 sm:$0xff]  ;;  %s285_s12 = sshll.u32 %s424_s5, 4  ;;  %s286_s12 = int_to_ptr.vmem [resolvable:$true] %s285_s12 }
  0x18   :  { %v304_v29 = vld [vmem:[%s538_s6] ss:$0 sm:$0xff]  ;;  %s395_s4 = scalar_lea.vmem %s286_s12, 128  ;;  %p400_p9 = scmp.lt.s32.totalorder %s286_s12, %s286_s12 }
  0x19   :  { %326 = vmatpush3.bf16.msra.mxu0 %v360_v2  ;;  %334 = vmatpush3.bf16.msra.mxu1 %v362_v6  ;;  %p396_p8 = scmp.ne.s32.totalorder %s286_s12, %s395_s4  ;;  %p401_p10 = scmp.lt.s32.totalorder %s395_s4, %s395_s4 }
  0x1a   :  { %343 = vmatprep.subr.bf16.mxu0 %v422_v0  ;;  %335 = vmatprep.subr.bf16.mxu1 %v422_v0 }
  0x1b   :  { %p402_p11 = por %p401_p10, %p400_p9 }
  0x1c   :  { %328 = vmatmul.mubr.msk.bf16.vlgmr.msra.gmra.mrb[0].mxu0 %vm65_vm1, %v41_v4 }
  0x1d   :  { %351 = vmatprep.mubr.msk.bf16.mxu0 %vm423_vm0, %v422_v0  ;;  %336 = vmatpush3.bf16.msra.mxu1 %v363_v7  ;;  %p403_p12 = pnand %p402_p11, %p396_p8 }
  0x1e   :  { %337 = vmatprep.subr.bf16.mxu1 %v422_v0  ;;  %344 = vmatpush3.bf16.msra.mxu0 %v365_v17 }
  0x1f   :  { %345 = vmatprep.subr.bf16.mxu0 %v422_v0 }
  0x21   :  { %338 = vmatpush3.bf16.msra.mxu1 %v364_v8 }
  0x22   :  { %346 = vmatpush3.bf16.msra.mxu0 %v366_v18 }
  0x23   :  { %347 = vmatprep.subr.bf16.mxu0 %v422_v0 }
  0x26   :  { %348 = vmatpush3.bf16.msra.mxu0 %v367_v19 }
  0x27   :  { %349 = vmatprep.subr.bf16.mxu0 %v422_v0 }
  0x2a   :  { %350 = vmatpush3.bf16.msra.mxu0 %v368_v20 }
  0xef   :  { %v103_v10 = vpop.f32.mrb[0].mxu0 }
  0xf0   :  { %v104_v11 = vadd.f32 %v294_v9, %v103_v10  ;;  %v329_v12 = vpop.f32.mrb[1].mxu0 }
  0xf1   :  { %v106_v13 = vpop.f32.mrb[2].mxu0 }
  0xf2   :  { %369 = vtanh.f32 %v104_v11  ;;  %v330_v14 = vpop.f32.mrb[3].mxu0 }
  0xfc   :  { %v370_v15 = vpop.eup %369 }
  0xfd   :  { %v110_v16 = vpack.c.bf16 %v370_v15, %v370_v15 }
  0xff   :  { %340 = vmatmul.mubr.msk.bf16.vlgmr.msra.gmra.mrb[0].mxu1 %vm150_vm2, %v110_v16 }
 0x1d2   :  { %v188_v22 = vpop.f32.mrb[0].mxu1 }
 0x1d3   :  { %v189_v23 = vadd.f32 %v298_v21, %v188_v22  ;;  %v341_v24 = vpop.f32.mrb[1].mxu1 }
 0x1d4   :  { %v191_v25 = vpop.f32.mrb[2].mxu1 }
 0x1d5   :  { %371 = vtanh.f32 %v189_v23  ;;  %v342_v26 = vpop.f32.mrb[3].mxu1 }
 0x1df   :  { %v372_v27 = vpop.eup %371 }
 0x1e0   :  { %v195_v28 = vpack.c.bf16 %v372_v27, %v372_v27 }
 0x1e2   :  { %352 = vmatmul.mubr.msk.bf16.vlgmr.msra.gmra.mrb[4].mxu0 %vm150_vm2, %v195_v28 }
 0x2b5   :  { %v272_v30 = vpop.f32.mrb[4].mxu0 }
 0x2b6   :  { %v273_v31 = vadd.f32 %v304_v29, %v272_v30  ;;  %v353_v32 = vpop.f32.mrb[5].mxu0 }
 0x2b7   :  { %v275_v33 = vpop.f32.mrb[6].mxu0 }
 0x2b8   :  { %278 = vst.msk [vmem:[#allocation5] sm:$0xff] %vm65_vm1, %v273_v31  ;;  %v354_v34 = vpop.f32.mrb[7].mxu0 }
 0x2b9   :  { %406 = shalt.err (!%p403_p12)
}
 0x2ba   :  { %s407_s6 = scalar_lea.hbm %s539_s7, 128 }
 0x2bb   :  { %p408_p13 = scmp.ne.s32.totalorder %s539_s7, %s407_s6  ;;  %p411_p0 = scmp.lt.u32.totalorder %s407_s6, %s539_s7 }
 0x2bd   :  { %p413_p1 = pnand %p411_p0, %p408_p13 }
 0x2bf   :  { %416 = shalt.err (!%p413_p1)
}
 0x2c0   :  { %288 = dma.vmem_to_hbm [thread:$0]  %s286_s12, 128, %s539_s7, [#allocation4]  }
 0x2c1   :  { %419 = dma.done.wait [#allocation4], 128  }
 0x2c2   :  { %420 = vsyncadd [#allocation4], 4294967168 }
 0x2c3   :  { %292 = vsyncpa [#allocation3], 1 }
 0x2c4   :  { %293 = vsyncpa [#allocation4], 1 }

</bundles_post_ra>
